<compile_context>
chip_gen: v7x
topology: tpu7x:2x2x1
jax: 0.10.0
libtpu: 0.0.40
codegen_flags: <defaults>
</compile_context>

<pallas_src>
import functools

import jax
import jax.numpy as jnp
from jax.experimental import pallas as pl
from jax.experimental.pallas import tpu as pltpu


def _space_to_depth_kernel(x_ref, s_ref, o_ref):
    # x_ref: (ct*H2, W2)        flattened (channel-tile, input-row) on the sublane axis
    # s_ref: (W2, bs*W)         s_ref[w2, bw*W + w] = 1.0 iff w2 == bs*w + bw
    # o_ref: (bs, bs, ct*H, W)  o_ref[bh, bw, c*H + h, w]
    bs = o_ref.shape[0]
    ch = o_ref.shape[2]                      # ct * H rows per phase
    w = o_ref.shape[3]
    sel = s_ref[...]                         # hoisted: single load of the resident constant
    for bh in range(bs):                     # static unroll over row phases
        # rows[(c*H + h), w2] = x[c, bs*h + bh, w2]  (sublane stride bs, lanes contiguous)
        rows = x_ref[pl.ds(bh, ch, stride=bs), :]
        # One matmul per row phase performs the stride-bs column gather + compaction
        # for every bw at once (columns are bw-major).
        cols = jnp.dot(
            rows, sel,
            preferred_element_type=jnp.float32,
            precision=jax.lax.Precision.HIGHEST,
        )
        for bw in range(bs):                 # static lane slices of the merged result
            o_ref[bh, bw] = cols[:, bw * w:(bw + 1) * w].astype(o_ref.dtype)


def _choose_channel_tile(C, H, H2, itemsize, budget_bytes=8 << 20):
    """Largest ct | C with sublane-aligned blocks whose pipelined VMEM cost fits budget."""
    bs = H2 // H
    lane_row_bytes = 128 * itemsize                 # narrow W/W2 pad to a full 128-lane row
    sublane = max(8, 32 // itemsize)                # 8 (f32), 16 (bf16), 32 (int8)

    def aligned(ct):
        return ct == C or ((ct * H) % sublane == 0 and (ct * H2) % sublane == 0)

    def cost(ct):
        in_rows = ct * H2                           # input block rows
        out_rows = bs * bs * ct * H                 # output block rows
        tmp_rows = 2 * ct * H                       # strided-load rows + matmul result
        # x2 = BlockSpec double buffering of in/out blocks.
        return (2 * (in_rows + out_rows) + tmp_rows) * lane_row_bytes

    candidates = [ct for ct in range(1, C + 1) if C % ct == 0 and aligned(ct)]
    fitting = [ct for ct in candidates if cost(ct) <= budget_bytes]
    return max(fitting) if fitting else min(candidates)


@functools.partial(jax.jit, static_argnames=("block_size",))
def space_to_depth(x, block_size=2):
    """x: [B, C, H*bs, W*bs] NCHW -> [B, C*bs*bs, H, W] (PyTorch SpaceToDepth order)."""
    bs = block_size
    B, C, H2, W2 = x.shape
    assert H2 % bs == 0 and W2 % bs == 0
    H, W = H2 // bs, W2 // bs
    # MXU-based selection path needs a float dtype (v7x MXU has no integer path).
    assert jnp.issubdtype(x.dtype, jnp.floating), "SpaceToDepth kernel expects float input"

    x2d = x.reshape(B, C * H2, W2)                  # free row-major view, no data movement

    # Constant 0/1 column-selection matrix, bw-major columns:
    #   sel[w2, bw*W + w] = 1 iff w2 == bs*w + bw
    w2_idx = jnp.arange(W2)[:, None]
    col_idx = jnp.arange(bs * W)[None, :]
    bw_idx, w_idx = col_idx // W, col_idx % W
    sel = (w2_idx == bs * w_idx + bw_idx).astype(x.dtype)         # (W2, bs*W)

    itemsize = x.dtype.itemsize
    ct = _choose_channel_tile(C, H, H2, itemsize)
    n_ct = C // ct

    cost = pl.CostEstimate(
        flops=2 * B * C * H2 * W2 * W2,             # tiny selection matmuls
        transcendentals=0,
        bytes_accessed=2 * B * C * H2 * W2 * itemsize,   # pure streaming permutation
    )

    out5 = pl.pallas_call(
        _space_to_depth_kernel,
        out_shape=jax.ShapeDtypeStruct((B, bs, bs, C * H, W), x.dtype),
        grid_spec=pltpu.PrefetchScalarGridSpec(
            num_scalar_prefetch=0,
            grid=(B, n_ct),
            in_specs=[
                pl.BlockSpec((None, ct * H2, W2), lambda b, ci: (b, ci, 0)),
                pl.BlockSpec((W2, bs * W), lambda b, ci: (0, 0)),   # resident constant
            ],
            out_specs=pl.BlockSpec((None, bs, bs, ct * H, W),
                                   lambda b, ci: (b, 0, 0, ci, 0)),
        ),
        compiler_params=pltpu.CompilerParams(
            dimension_semantics=("parallel", "parallel")),
        cost_estimate=cost,
    )(x2d, sel)

    # Free reshape: (bh, bw, c*H + h, w) -> channel (bh*bs + bw)*C + c, row h, col w.
    return out5.reshape(B, bs * bs * C, H, W)


def space_to_depth_reference(x, block_size):
    # Faithful JAX port of the PyTorch SpaceToDepth.forward (for validation).
    bs = block_size
    y = jnp.transpose(x, (0, 2, 3, 1))                     # permute(0, 2, 3, 1)
    B, H2, W2, C = y.shape
    d_depth = C * bs * bs
    d_height = H2 // bs
    splits = [y[:, :, i * bs:(i + 1) * bs, :] for i in range(W2 // bs)]  # split(bs, dim=2)
    stack = [t.reshape(B, d_height, d_depth) for t in splits]
    y = jnp.stack(stack, axis=1)                           # stack(dim=1)
    y = jnp.transpose(y, (0, 2, 1, 3))                     # permute(0, 2, 1, 3)
    y = jnp.transpose(y, (0, 3, 1, 2))                     # permute(0, 3, 1, 2)
    return y


if __name__ == "__main__":
    B, C, H2, W2 = 2, 4, 16, 16
    key = jax.random.PRNGKey(0)
    x = jax.random.normal(key, (B, C, H2, W2), dtype=jnp.float32)

    out = space_to_depth(x, block_size=2)
    out = jax.block_until_ready(out)

    ref = space_to_depth_reference(x, block_size=2)
    assert out.shape == (B, 4 * C, H2 // 2, W2 // 2), out.shape
    assert jnp.allclose(out, ref, atol=1e-5, rtol=1e-5), float(jnp.max(jnp.abs(out - ref)))

    print("KERNEL_OK")
</pallas_src>

<mosaic_0001>
module attributes {stable_mosaic.version = 11 : i64} {
  func.func @_space_to_depth_kernel(%arg0: i32, %arg1: i32, %arg2: memref<1x64x16xf32, #tpu.memory_space<vmem>>, %arg3: memref<16x16xf32, #tpu.memory_space<vmem>>, %arg4: memref<1x2x2x32x8xf32, #tpu.memory_space<vmem>>) attributes {dimension_semantics = [#tpu.dimension_semantics<parallel>, #tpu.dimension_semantics<parallel>], iteration_bounds = array<i64: 2, 1>, scalar_prefetch = 0 : i64, scratch_operands = 0 : i64, tpu.core_type = #tpu.core_type<tc>, window_params = [{transform_indices = @transform_0, window_bounds = array<i64: 1, 64, 16>}, {pipeline_mode = #tpu.pipeline_mode<synchronous>, transform_indices = @transform_1, window_bounds = array<i64: 16, 16>}, {transform_indices = @transform_2, window_bounds = array<i64: 1, 2, 2, 32, 8>}]} {
    %c0 = arith.constant 0 : index
    %c0_0 = arith.constant 0 : index
    %0 = vector.load %arg3[%c0, %c0_0] : memref<16x16xf32, #tpu.memory_space<vmem>>, vector<16x16xf32>
    %c0_1 = arith.constant 0 : index
    %c0_2 = arith.constant 0 : index
    %c0_3 = arith.constant 0 : index
    %1 = tpu.strided_load %arg2[%c0_1, %c0_2, %c0_3] {strides = array<i32: 1, 2, 1>} : memref<1x64x16xf32, #tpu.memory_space<vmem>>, vector<1x32x16xf32>
    %2 = vector.shape_cast %1 : vector<1x32x16xf32> to vector<32x16xf32>
    %cst = arith.constant dense<0.000000e+00> : vector<32x16xf32>
    %3 = tpu.matmul %2, %0, %cst {dimension_numbers = #tpu.dot_dimension_numbers<[1], [0], [0], [1], [0, 0, 1, 1], [], []>, precision = #tpu.contract_precision<fp32>} : vector<32x16xf32>, vector<16x16xf32>, vector<32x16xf32> -> vector<32x16xf32>
    %4 = vector.extract_strided_slice %3 {offsets = [0, 0], sizes = [32, 8], strides = [1, 1]} : vector<32x16xf32> to vector<32x8xf32>
    %c0_4 = arith.constant 0 : index
    %c0_5 = arith.constant 0 : index
    %c0_6 = arith.constant 0 : index
    %c0_7 = arith.constant 0 : index
    %c0_8 = arith.constant 0 : index
    %5 = vector.load %arg4[%c0_4, %c0_5, %c0_6, %c0_7, %c0_8] : memref<1x2x2x32x8xf32, #tpu.memory_space<vmem>>, vector<1x1x1x32x8xf32>
    %6 = vector.shape_cast %5 : vector<1x1x1x32x8xf32> to vector<32x8xf32>
    %7 = vector.shape_cast %4 : vector<32x8xf32> to vector<1x1x1x32x8xf32>
    tpu.vector_store %arg4[%c0_4, %c0_5, %c0_6, %c0_7, %c0_8], %7 {strides = array<i32>} : memref<1x2x2x32x8xf32, #tpu.memory_space<vmem>>, vector<1x1x1x32x8xf32>,
    %8 = vector.extract_strided_slice %3 {offsets = [0, 8], sizes = [32, 8], strides = [1, 1]} : vector<32x16xf32> to vector<32x8xf32>
    %c0_9 = arith.constant 0 : index
    %c0_10 = arith.constant 0 : index
    %c1 = arith.constant 1 : index
    %c0_11 = arith.constant 0 : index
    %c0_12 = arith.constant 0 : index
    %9 = vector.load %arg4[%c0_9, %c0_10, %c1, %c0_11, %c0_12] : memref<1x2x2x32x8xf32, #tpu.memory_space<vmem>>, vector<1x1x1x32x8xf32>
    %10 = vector.shape_cast %9 : vector<1x1x1x32x8xf32> to vector<32x8xf32>
    %11 = vector.shape_cast %8 : vector<32x8xf32> to vector<1x1x1x32x8xf32>
    tpu.vector_store %arg4[%c0_9, %c0_10, %c1, %c0_11, %c0_12], %11 {strides = array<i32>} : memref<1x2x2x32x8xf32, #tpu.memory_space<vmem>>, vector<1x1x1x32x8xf32>,
    %c0_13 = arith.constant 0 : index
    %c1_14 = arith.constant 1 : index
    %c0_15 = arith.constant 0 : index
    %12 = tpu.strided_load %arg2[%c0_13, %c1_14, %c0_15] {strides = array<i32: 1, 2, 1>} : memref<1x64x16xf32, #tpu.memory_space<vmem>>, vector<1x32x16xf32>
    %13 = vector.shape_cast %12 : vector<1x32x16xf32> to vector<32x16xf32>
    %cst_16 = arith.constant dense<0.000000e+00> : vector<32x16xf32>
    %14 = tpu.matmul %13, %0, %cst_16 {dimension_numbers = #tpu.dot_dimension_numbers<[1], [0], [0], [1], [0, 0, 1, 1], [], []>, precision = #tpu.contract_precision<fp32>} : vector<32x16xf32>, vector<16x16xf32>, vector<32x16xf32> -> vector<32x16xf32>
    %15 = vector.extract_strided_slice %14 {offsets = [0, 0], sizes = [32, 8], strides = [1, 1]} : vector<32x16xf32> to vector<32x8xf32>
    %c0_17 = arith.constant 0 : index
    %c1_18 = arith.constant 1 : index
    %c0_19 = arith.constant 0 : index
    %c0_20 = arith.constant 0 : index
    %c0_21 = arith.constant 0 : index
    %16 = vector.load %arg4[%c0_17, %c1_18, %c0_19, %c0_20, %c0_21] : memref<1x2x2x32x8xf32, #tpu.memory_space<vmem>>, vector<1x1x1x32x8xf32>
    %17 = vector.shape_cast %16 : vector<1x1x1x32x8xf32> to vector<32x8xf32>
    %18 = vector.shape_cast %15 : vector<32x8xf32> to vector<1x1x1x32x8xf32>
    tpu.vector_store %arg4[%c0_17, %c1_18, %c0_19, %c0_20, %c0_21], %18 {strides = array<i32>} : memref<1x2x2x32x8xf32, #tpu.memory_space<vmem>>, vector<1x1x1x32x8xf32>,
    %19 = vector.extract_strided_slice %14 {offsets = [0, 8], sizes = [32, 8], strides = [1, 1]} : vector<32x16xf32> to vector<32x8xf32>
    %c0_22 = arith.constant 0 : index
    %c1_23 = arith.constant 1 : index
    %c1_24 = arith.constant 1 : index
    %c0_25 = arith.constant 0 : index
    %c0_26 = arith.constant 0 : index
    %20 = vector.load %arg4[%c0_22, %c1_23, %c1_24, %c0_25, %c0_26] : memref<1x2x2x32x8xf32, #tpu.memory_space<vmem>>, vector<1x1x1x32x8xf32>
    %21 = vector.shape_cast %20 : vector<1x1x1x32x8xf32> to vector<32x8xf32>
    %22 = vector.shape_cast %19 : vector<32x8xf32> to vector<1x1x1x32x8xf32>
    tpu.vector_store %arg4[%c0_22, %c1_23, %c1_24, %c0_25, %c0_26], %22 {strides = array<i32>} : memref<1x2x2x32x8xf32, #tpu.memory_space<vmem>>, vector<1x1x1x32x8xf32>,
    return
  }
  func.func @transform_0(%arg0: i32, %arg1: i32) -> (i32, i32, i32) {
    %c0_i32 = arith.constant 0 : i32
    %c0_i32_0 = arith.constant 0 : i32
    return %arg0, %arg1, %c0_i32 : i32, i32, i32
  }
  func.func @transform_1(%arg0: i32, %arg1: i32) -> (i32, i32) {
    %c0_i32 = arith.constant 0 : i32
    %c0_i32_0 = arith.constant 0 : i32
    %c0_i32_1 = arith.constant 0 : i32
    return %c0_i32, %c0_i32_0 : i32, i32
  }
  func.func @transform_2(%arg0: i32, %arg1: i32) -> (i32, i32, i32, i32, i32) {
    %c0_i32 = arith.constant 0 : i32
    %c0_i32_0 = arith.constant 0 : i32
    %c0_i32_1 = arith.constant 0 : i32
    %c0_i32_2 = arith.constant 0 : i32
    return %arg0, %c0_i32, %c0_i32_0, %arg1, %c0_i32_1 : i32, i32, i32, i32, i32
  }
}

</mosaic_0001>

<bundles_post_ra>
// kernel: space_to_depth.1
= control target key start
LH: loop header
LB: loop body
LE: loop exit
PB: predicated region body
PF: predicated region fallthrough
CT: control target
= control target key end

     0   :  { %7 = vsyncpa [#allocation3], 0  ;;  %s2342_s0 = inlined_call_operand.hbm [shape: f32[2,64,16], index: 0, kind: input, shape index: {}]   ;;  %s2343_s1 = inlined_call_operand.vmem [shape: f32[16,16], index: 1, kind: input, shape index: {}]   ;;  %s2344_s2 = inlined_call_operand.vmem [shape: f32[2,2,2,32,8], index: 2, kind: output, shape index: {}]  }
   0x1   :  { %9 = vsyncpa [#allocation3 + $0x1], 0  ;;  %s2030_s9 = smov 0   ;;  %s2032_s10 = smov 0  }
   0x2   :  { %s2034_s11 = smov 0   ;;  %s2036_s12 = smov 0  }
   0x3   :  { %s2038_s13 = smov 0   ;;  %s2040_s14 = smov 0  }
   0x4 LB: > { %s1557_s15 = sadd.s32 4294967295, %s2009_s14   ;;  %s27_s16 = sadd.s32 1, %s2005_s13  ;;  %s2009_s14 = sphi %s2040_s14, %s15_s14   ;;  %s2005_s13 = sphi %s2038_s13, %s2352_s13   ;;  %s2001_s12 = sphi %s2036_s12, %s2351_s12   ;;  %s1997_s11 = sphi %s2034_s11, %s2350_s11   ;;  %s1993_s10 = sphi %s2032_s10, %s2349_s10   ;;  %s1989_s9 = sphi %s2030_s9, %s2348_s9  }
   0x5   : > { %p29_p0 = scmp.ge.s32.totalorder %s27_s16, 2  ;;  %s36_s17 = sadd.s32 1, %s1997_s11 }
   0x6   : > { %p43_p1 = scmp.ne.s32.totalorder %s1997_s11, %s1993_s10  ;;  %p44_p2 = scmp.eq.s32.totalorder %s2009_s14, 0 }
   0x7   : > { %s2354_s16 = smov (%p29_p0, %s27_s16), 0  ;;  %p49_p4 = scmp.ne.s32.totalorder %s1993_s10, %s1989_s9 }
   0x8   : > { %p2066_p3 = por %p44_p2, %p43_p1  ;;  %s31_s19 = ssub.s32 %s2005_s13, %s2354_s16 }
   0x9   : > { %p50_p5 = scmp.eq.s32.totalorder %s1557_s15, 0  ;;  %p34_p6 = scmp.eq.s32.totalorder %s31_s19, 0 }
   0xa   : > { %p1877_p8 = scmp.lt.s32.totalorder %s2009_s14, 2  ;;  %s125_s22 = sand.u32 1, %s1997_s11  }
   0xb   : > { %p2073_p7 = por %p50_p5, %p49_p4  ;;  %s1589_s23 = sshll.u32 %s2005_s13, 10 }
   0xc   : > { %s2079_s21 = scalar_select %p34_p6, %s1997_s11, %s36_s17  }
   0xd   : > { %s1561_s24 = sshll.u32 %s125_s22, 6  ;;  %s2086_s27 = scalar_lea.hbm %s2342_s0, %s1589_s23 }
   0xe   : > { %s129_s28 = scalar_lea.vmem [#allocation2], %s1561_s24  ;;  %p2090_p9 = pnand %p1877_p8, %p2066_p3 }
   0xf   : > { %s138_s29 = sshll.u32 %s129_s28, 4  ;;  %s2096_s3 = scalar_lea.sflag [#allocation3], %s125_s22  ;;  %s2094_s29 = int_to_ptr.vmem [resolvable:$true] %s138_s29 }
  0x10   : > { %s1929_s4 = scalar_lea.hbm %s2086_s27, 1024  ;;  %p1931_p11 = pneg %p2090_p9 }
  0x11   : > { %p1930_p10 = scmp.ne.s32.totalorder %s2086_s27, %s1929_s4  ;;  %s1934_s7 = scalar_lea.hbm %s2342_s0, 2048 }
  0x12   : > { %p1935_p0 = scmp.lt.u32.totalorder %s2086_s27, %s2342_s0  ;;  %p1936_p1 = scmp.lt.u32.totalorder %s1934_s7, %s1929_s4 }
  0x13   : > { %p1932_p12 = pnand %p1931_p11, %p1930_p10  ;;  %p1938_p3 = scmp.lt.u32.totalorder %s1929_s4, %s2086_s27 }
  0x14   : > { %p1937_p2 = por %p1936_p1, %p1935_p0 }
  0x15   : > { %p1933_p13 = pneg %p1932_p12 }
  0x16   : > { %p1939_p4 = por %p1938_p3, %p1937_p2 }
  0x18   : > { %p1940_p5 = pnand %p1939_p4, %p1933_p13 }
  0x1a   : > { %1943 = shalt.err (!%p1940_p5)
}
  0x1b   : > { %s1944_s15 = scalar_lea.vmem %s2094_s29, 1024  ;;  %s2011_s17 = smov [#allocation2]  }
  0x1c   : > { %p1945_p6 = scmp.ne.s32.totalorder %s2094_s29, %s1944_s15  ;;  %s1949_s18 = sshll.u32 %s2011_s17, 4  ;;  %s1950_s18 = int_to_ptr.vmem [resolvable:$false] %s1949_s18 }
  0x1d   : > { %s1951_s19 = scalar_lea.vmem %s1950_s18, 2048  ;;  %p1952_p12 = scmp.lt.s32.totalorder %s2094_s29, %s1950_s18 }
  0x1e   : > { %p1947_p8 = pnand %p1945_p6, %p1931_p11  ;;  %p1953_p0 = scmp.lt.s32.totalorder %s1951_s19, %s1944_s15 }
  0x20   : > { %p1948_p10 = pneg %p1947_p8  ;;  %p1954_p1 = por %p1953_p0, %p1952_p12 }
  0x22   : > { %p1955_p2 = pnand %p1954_p1, %p1948_p10 }
  0x24   : > { %1958 = shalt.err (!%p1955_p2)
}
  0x25   : > { %s2012_s22 = smov 128   ;;  %s2013_s23 = smov 8  }
  0x26   : > { %1876 = dma.hbm_to_vmem [thread:$0]  (!%p2090_p9), %s2086_s27, 1024, %s2094_s29, %s2096_s3, %s2012_s22, %s2012_s22, %s2013_s23  }
  0x27   : > { %p1564_p11 = scmp.ge.s32.totalorder %s2009_s14, 1  ;;  %p146_p13 = scmp.lt.s32.totalorder %s2009_s14, 3 }
  0x29   : > { %p147_p3 = pnand %p1564_p11, %p146_p13 }
  0x2a   : > { %s152_s24 = sand.u32 (!%p147_p3), 1, %s1993_s10  }
  0x2b   : > { %150 = sbr.rel (%p147_p3) target bundleno = 452 (0x1c4), region = 28  ;;  %s1565_s25 = sshll.u32 (!%p147_p3), %s152_s24, 6 }
  0x2c   : > { %s153_s26 = scalar_lea.sflag (!%p147_p3), [#allocation3], %s152_s24  ;;  %s2127_s28 = scalar_lea.vmem (!%p147_p3), [#allocation2], %s1565_s25 }
  0x32   : > { %1984 = dma.done.wait (%p2073_p7), %s153_s26, 1024  }
  0x33   : > { %1986 = vsyncadd (%p2073_p7), %s153_s26, 4294966272  ;;  %vm201_vm0 = vcmask 130048   ;;  %v192_v0 = vld [vmem:[%s2343_s1] sm:$0xff]  ;;  %v193_v1 = vld [vmem:[%s2343_s1 + $0x8] sm:$0xff]  ;;  %p183_p7 = scmp.lt.s32.totalorder %s2001_s12, 1  ;;  %vm802_vm1 = vcmask 64512  }
  0x34   : > { %v194_v2 = vld [vmem:[%s2127_s28] ss:$2 sm:$0xff]  ;;  %v215_v3 = vand.u32 4294901760, %v192_v0  ;;  %v218_v4 = vand.u32 4294901760, %v193_v1  ;;  %v1575_v6 = vld [vmem:[%s2127_s28 + $0x1] ss:$2 sm:$0xff] }
  0x35   : > { %v203_v5 = vsel %vm201_vm0, %v194_v2, 0  ;;  %v837_v8 = vsel %vm201_vm0, %v1575_v6, 0  ;;  %v1568_v9 = vld [vmem:[%s2127_s28 + $0x10] ss:$2 sm:$0xff]  ;;  %v1576_v10 = vld [vmem:[%s2127_s28 + $0x11] ss:$2 sm:$0xff] }
  0x36   : > { %v2142_v7 = vand.u32 4294901760, %v203_v5  ;;  %v2147_v11 = vpack.c.bf16 %v218_v4, %v215_v3  ;;  %v2149_v12 = vand.u32 4294901760, %v837_v8  ;;  %v206_v13 = vsel %vm201_vm0, %v1568_v9, 0  ;;  %v1569_v15 = vld [vmem:[%s2127_s28 + $0x20] ss:$2 sm:$0xff]  ;;  %s2356_s12 = smov (!%p183_p7, %s2001_s12), 1 }
  0x37   : > { %v2152_v14 = vsub.f32 %v192_v0, %v215_v3  ;;  %v2158_v17 = vand.u32 4294901760, %v206_v13  ;;  %v2160_v18 = vsub.f32 %v193_v1, %v218_v4  ;;  %v840_v19 = vsel %vm201_vm0, %v1576_v10, 0  ;;  %v1577_v20 = vld [vmem:[%s2127_s28 + $0x21] ss:$2 sm:$0xff]  ;;  %v1570_v37 = vld [vmem:[%s2127_s28 + $0x30] ss:$2 sm:$0xff] }
  0x38   : > { %v2156_v16 = vsub.f32 %v203_v5, %v2142_v7  ;;  %1784 = vmatprep.subr.bf16.mxu0 %v2147_v11  ;;  %1808 = vmatprep.subr.bf16.mxu1 %v2147_v11  ;;  %v2167_v21 = vsub.f32 %v837_v8, %v2149_v12  ;;  %v2170_v23 = vand.u32 4294901760, %v840_v19  ;;  %v209_v24 = vsel %vm201_vm0, %v1569_v15, 0  ;;  %v1578_v46 = vld [vmem:[%s2127_s28 + $0x31] ss:$2 sm:$0xff]  ;;  %s1590_s20 = sshll.u32 %s2356_s12, 7  ;;  %s2014_s7 = smov 120  }
  0x39   : > { %v324_v22 = vand.u32 4294901760, %v2152_v14  ;;  %1786 = vmatpush3.bf16.msra.mxu0 %v2147_v11  ;;  %1810 = vmatpush3.bf16.msra.mxu1 %v2147_v11  ;;  %v2177_v26 = vsub.f32 %v206_v13, %v2158_v17  ;;  %v331_v27 = vand.u32 4294901760, %v2160_v18  ;;  %v2180_v28 = vand.u32 4294901760, %v209_v24  ;;  %s2290_s6 = scalar_lea.vmem %s2344_s2, %s1590_s20 }
  0x3a   : > { %v283_v25 = vand.u32 4294901760, %v2156_v16  ;;  %v917_v29 = vand.u32 4294901760, %v2167_v21  ;;  %v2187_v31 = vsub.f32 %v840_v19, %v2170_v23  ;;  %v843_v32 = vsel %vm201_vm0, %v1577_v20, 0 }
  0x3b   : > { %v325_v30 = vsub.f32 %v2152_v14, %v324_v22  ;;  %v293_v34 = vand.u32 4294901760, %v2177_v26  ;;  %v332_v35 = vsub.f32 %v2160_v18, %v331_v27  ;;  %v2198_v36 = vsub.f32 %v209_v24, %v2180_v28 }
  0x3c   : > { %v284_v33 = vsub.f32 %v2156_v16, %v283_v25  ;;  %v918_v38 = vsub.f32 %v2167_v21, %v917_v29  ;;  %v927_v40 = vand.u32 4294901760, %v2187_v31  ;;  %v2205_v41 = vand.u32 4294901760, %v843_v32 }
  0x3d   : > { %v326_v39 = vand.u32 4294901760, %v325_v30  ;;  %v294_v43 = vsub.f32 %v2177_v26, %v293_v34  ;;  %v333_v44 = vand.u32 4294901760, %v332_v35  ;;  %v303_v45 = vand.u32 4294901760, %v2198_v36 }
  0x3e   : > { %v285_v42 = vand.u32 4294901760, %v284_v33  ;;  %v919_v47 = vand.u32 4294901760, %v918_v38  ;;  %v928_v48 = vsub.f32 %v2187_v31, %v927_v40  ;;  %v2216_v49 = vsub.f32 %v843_v32, %v2205_v41 }
  0x3f   : > { %v212_v50 = vsel %vm201_vm0, %v1570_v37, 0  ;;  %v295_v51 = vand.u32 4294901760, %v294_v43  ;;  %v1787_v52 = vpack.c.bf16 %v333_v44, %v326_v39  ;;  %v304_v53 = vsub.f32 %v2198_v36, %v303_v45 }
  0x40   : > { %1667 = vmatprep.mubr.f32.mxu0 %v285_v42  ;;  %v2222_v54 = vand.u32 4294901760, %v212_v50  ;;  %1727 = vmatprep.mubr.f32.mxu1 %v919_v47  ;;  %v929_v55 = vand.u32 4294901760, %v928_v48  ;;  %v937_v56 = vand.u32 4294901760, %v2216_v49  ;;  %v846_v57 = vsel %vm201_vm0, %v1578_v46, 0 }
  0x41   : > { %v1791_v58 = vpack.c.bf16 %v2160_v18, %v2152_v14  ;;  %1668 = vmatmul.mubr.f32.vlgmr.msra.gmra.mrb[0].mxu0 %v295_v51  ;;  %1788 = vmatprep.subr.bf16.mxu0 %v1787_v52  ;;  %v305_v59 = vand.u32 4294901760, %v304_v53  ;;  %v2229_v61 = vand.u32 4294901760, %v846_v57  ;;  %v1799_v8 = vpack.c.bf16 %v331_v27, %v324_v22 }
  0x42   : > { %v312_v60 = vsub.f32 %v212_v50, %v2222_v54  ;;  %1728 = vmatmul.mubr.f32.vlgmr.msra.gmra.mrb[0].mxu1 %v929_v55  ;;  %1812 = vmatprep.subr.bf16.mxu1 %v1787_v52  ;;  %v938_v62 = vsub.f32 %v2216_v49, %v937_v56 }
  0x43   : > { %1790 = vmatpush3.bf16.msra.mxu0 %v1787_v52  ;;  %1814 = vmatpush3.bf16.msra.mxu1 %v1787_v52  ;;  %v946_v0 = vsub.f32 %v846_v57, %v2229_v61 }
  0x44   : > { %v313_v63 = vand.u32 4294901760, %v312_v60  ;;  %1670 = vmatprep.mubr.f32.mxu0 %v305_v59  ;;  %v939_v1 = vand.u32 4294901760, %v938_v62  ;;  %1792 = vmatprep.subr.bf16.mxu0 %v1791_v58 }
  0x45   : > { %v947_v3 = vand.u32 4294901760, %v946_v0  ;;  %1816 = vmatprep.subr.bf16.mxu1 %v1791_v58 }
  0x46   : > { %v314_v2 = vsub.f32 %v312_v60, %v313_v63  ;;  %1730 = vmatprep.mubr.f32.mxu1 %v939_v1 }
  0x47   : > { %v948_v5 = vsub.f32 %v946_v0, %v947_v3 }
  0x48   : > { %v315_v4 = vand.u32 4294901760, %v314_v2 }
  0x49   : > { %v949_v6 = vand.u32 4294901760, %v948_v5 }
  0x4a   : > { %1671 = vmatmul.mubr.f32.gmra.mrb[2].mxu0 %v315_v4 }
  0x4b   : > { %1677 = vmatprep.mubr.f32.mxu0 %v2142_v7  ;;  %1731 = vmatmul.mubr.f32.gmra.mrb[2].mxu1 %v949_v6 }
  0x4c   : > { %1737 = vmatprep.mubr.f32.mxu1 %v2149_v12 }
  0x4e   : > { %1678 = vmatmul.mubr.f32.vlgmr.msra.gmra.mrb[0].mxu0 %v2158_v17 }
  0x4f   : > { %1794 = vmatpush3.bf16.msra.mxu0 %v1791_v58  ;;  %1680 = vmatprep.mubr.f32.mxu0 %v2180_v28 }
  0x50   : > { %1738 = vmatmul.mubr.f32.vlgmr.msra.gmra.mrb[0].mxu1 %v2170_v23  ;;  %1796 = vmatprep.subr.bf16.mxu0 %v2147_v11 }
  0x51   : > { %1818 = vmatpush3.bf16.msra.mxu1 %v1791_v58  ;;  %1740 = vmatprep.mubr.f32.mxu1 %v2205_v41 }
  0x52   : > { %1681 = vmatmul.mubr.f32.gmra.mrb[2].mxu0 %v2222_v54  ;;  %1820 = vmatprep.subr.bf16.mxu1 %v2147_v11 }
  0x53   : > { %1687 = vmatprep.mubr.f32.mxu0 %v2156_v16 }
  0x54   : > { %1741 = vmatmul.mubr.f32.gmra.mrb[2].mxu1 %v2229_v61 }
  0x55   : > { %1747 = vmatprep.mubr.f32.mxu1 %v2167_v21 }
  0x56   : > { %1688 = vmatmul.mubr.f32.vlgmr.msra.gmra.mrb[0].mxu0 %v2177_v26 }
  0x57   : > { %1798 = vmatpush3.bf16.msra.mxu0 %v2147_v11  ;;  %1690 = vmatprep.mubr.f32.mxu0 %v2198_v36 }
  0x58   : > { %1748 = vmatmul.mubr.f32.vlgmr.msra.gmra.mrb[0].mxu1 %v2187_v31  ;;  %1800 = vmatprep.subr.bf16.mxu0 %v1799_v8 }
  0x59   : > { %1822 = vmatpush3.bf16.msra.mxu1 %v2147_v11  ;;  %1750 = vmatprep.mubr.f32.mxu1 %v2216_v49 }
  0x5a   : > { %1691 = vmatmul.mubr.f32.gmra.mrb[2].mxu0 %v312_v60  ;;  %1824 = vmatprep.subr.bf16.mxu1 %v1799_v8 }
  0x5b   : > { %1697 = vmatprep.mubr.f32.mxu0 %v283_v25 }
  0x5c   : > { %1751 = vmatmul.mubr.f32.gmra.mrb[2].mxu1 %v946_v0 }
  0x5d   : > { %1757 = vmatprep.mubr.f32.mxu1 %v917_v29 }
  0x5e   : > { %1698 = vmatmul.mubr.f32.vlgmr.msra.gmra.mrb[0].mxu0 %v293_v34 }
  0x5f   : > { %1802 = vmatpush3.bf16.msra.mxu0 %v1799_v8  ;;  %1700 = vmatprep.mubr.f32.mxu0 %v303_v45 }
  0x60   : > { %1758 = vmatmul.mubr.f32.vlgmr.msra.gmra.mrb[0].mxu1 %v927_v40  ;;  %1804 = vmatprep.subr.bf16.mxu0 %v2147_v11 }
  0x61   : > { %1826 = vmatpush3.bf16.msra.mxu1 %v1799_v8  ;;  %1760 = vmatprep.mubr.f32.mxu1 %v937_v56 }
  0x62   : > { %1701 = vmatmul.mubr.f32.gmra.mrb[2].mxu0 %v313_v63  ;;  %1828 = vmatprep.subr.bf16.mxu1 %v2147_v11 }
  0x63   : > { %1707 = vmatprep.mubr.f32.mxu0 %v2142_v7 }
  0x64   : > { %1761 = vmatmul.mubr.f32.gmra.mrb[2].mxu1 %v947_v3 }
  0x65   : > { %1767 = vmatprep.mubr.f32.mxu1 %v2149_v12 }
  0x66   : > { %1708 = vmatmul.mubr.f32.vlgmr.msra.gmra.mrb[0].mxu0 %v2158_v17 }
  0x67   : > { %1806 = vmatpush3.bf16.msra.mxu0 %v2147_v11  ;;  %1710 = vmatprep.mubr.f32.mxu0 %v2180_v28 }
  0x68   : > { %1768 = vmatmul.mubr.f32.vlgmr.msra.gmra.mrb[0].mxu1 %v2170_v23 }
  0x69   : > { %1830 = vmatpush3.bf16.msra.mxu1 %v2147_v11  ;;  %1770 = vmatprep.mubr.f32.mxu1 %v2205_v41 }
  0x6a   : > { %1711 = vmatmul.mubr.f32.gmra.mrb[2].mxu0 %v2222_v54 }
  0x6b   : > { %1717 = vmatprep.mubr.f32.mxu0 %v2142_v7 }
  0x6c   : > { %1771 = vmatmul.mubr.f32.gmra.mrb[2].mxu1 %v2229_v61 }
  0x6d   : > { %1777 = vmatprep.mubr.f32.mxu1 %v2149_v12 }
  0x6e   : > { %1718 = vmatmul.mubr.f32.vlgmr.msra.gmra.mrb[0].mxu0 %v2158_v17 }
  0x6f   : > { %1720 = vmatprep.mubr.f32.mxu0 %v2180_v28 }
  0x70   : > { %1778 = vmatmul.mubr.f32.vlgmr.msra.gmra.mrb[0].mxu1 %v2170_v23 }
  0x71   : > { %1780 = vmatprep.mubr.f32.mxu1 %v2205_v41 }
  0x72   : > { %1721 = vmatmul.mubr.f32.gmra.mrb[2].mxu0 %v2222_v54 }
  0x74   : > { %1781 = vmatmul.mubr.f32.gmra.mrb[2].mxu1 %v2229_v61 }
 0x141   : > { %v1719_v7 = vpop.f32.mrb[0].mxu0 }
 0x142   : > { %804 = vst.msk [vmem:[%s2290_s6 + $0x8] sm:$0xff] %vm802_vm1, %v1719_v7  ;;  %813 = vrot.lane.b32.xlu0 %v1719_v7, %s2014_s7  ;;  %v780_v9 = vpop.f32.mrb[1].mxu0 }
 0x143   : > { %v1779_v10 = vpop.f32.mrb[0].mxu1  ;;  %803 = vst.msk [vmem:[%s2290_s6] sm:$0xff] %vm802_vm1, %v780_v9 }
 0x144   : > { %1580 = vst.msk [vmem:[%s2290_s6 + $0x48] sm:$0xff] %vm802_vm1, %v1779_v10  ;;  %1447 = vrot.lane.b32.xlu1 %v1779_v10, %s2014_s7  ;;  %v1414_v11 = vpop.f32.mrb[1].mxu1 }
 0x145   : > { %1579 = vst.msk [vmem:[%s2290_s6 + $0x40] sm:$0xff] %vm802_vm1, %v1414_v11  ;;  %v1722_v12 = vpop.f32.mrb[2].mxu0 }
 0x146   : > { %806 = vst.msk [vmem:[%s2290_s6 + $0x18] sm:$0xff] %vm802_vm1, %v1722_v12  ;;  %811 = vrot.lane.b32.xlu0 %v780_v9, %s2014_s7  ;;  %v792_v13 = vpop.f32.mrb[3].mxu0 }
 0x147   : > { %v1782_v14 = vpop.f32.mrb[2].mxu1  ;;  %805 = vst.msk [vmem:[%s2290_s6 + $0x10] sm:$0xff] %vm802_vm1, %v792_v13 }
 0x148   : > { %1582 = vst.msk [vmem:[%s2290_s6 + $0x58] sm:$0xff] %vm802_vm1, %v1782_v14  ;;  %v1426_v15 = vpop.f32.mrb[3].mxu1  ;;  %817 = vrot.lane.b32.xlu1 %v1722_v12, %s2014_s7 }
 0x149   : > { %1581 = vst.msk [vmem:[%s2290_s6 + $0x50] sm:$0xff] %vm802_vm1, %v1426_v15 }
 0x14a   : > { %1445 = vrot.lane.b32.xlu0 %v1414_v11, %s2014_s7 }
 0x14c   : > { %815 = vrot.lane.b32.xlu1 %v792_v13, %s2014_s7 }
 0x14e   : > { %1449 = vrot.lane.b32.xlu0 %v1426_v15, %s2014_s7 }
 0x150   : > { %1451 = vrot.lane.b32.xlu1 %v1782_v14, %s2014_s7 }
 0x1b4   : > { %v814_v16 = vpop.permute.xlu0 %813 }
 0x1b5   : > { %1572 = vst.msk [vmem:[%s2290_s6 + $0x28] sm:$0xff] %vm802_vm1, %v814_v16 }
 0x1b6   : > { %v1448_v17 = vpop.permute.xlu1 %1447 }
 0x1b7   : > { %1584 = vst.msk [vmem:[%s2290_s6 + $0x68] sm:$0xff] %vm802_vm1, %v1448_v17 }
 0x1b8   : > { %v812_v18 = vpop.permute.xlu0 %811 }
 0x1b9   : > { %1571 = vst.msk [vmem:[%s2290_s6 + $0x20] sm:$0xff] %vm802_vm1, %v812_v18 }
 0x1ba   : > { %v818_v19 = vpop.permute.xlu1 %817 }
 0x1bb   : > { %1574 = vst.msk [vmem:[%s2290_s6 + $0x38] sm:$0xff] %vm802_vm1, %v818_v19 }
 0x1bc   : > { %v1446_v20 = vpop.permute.xlu0 %1445 }
 0x1bd   : > { %1583 = vst.msk [vmem:[%s2290_s6 + $0x60] sm:$0xff] %vm802_vm1, %v1446_v20 }
 0x1be   : > { %v816_v21 = vpop.permute.xlu1 %815 }
 0x1bf   : > { %1573 = vst.msk [vmem:[%s2290_s6 + $0x30] sm:$0xff] %vm802_vm1, %v816_v21 }
 0x1c0   : > { %v1450_v22 = vpop.permute.xlu0 %1449 }
 0x1c1   : > { %1585 = vst.msk [vmem:[%s2290_s6 + $0x70] sm:$0xff] %vm802_vm1, %v1450_v22 }
 0x1c2   : > { %v1452_v23 = vpop.permute.xlu1 %1451 }
 0x1c3   : > { %1586 = vst.msk [vmem:[%s2290_s6 + $0x78] sm:$0xff] %vm802_vm1, %v1452_v23 }
 0x1c4 PF: > { %s15_s14 = sadd.s32 1, %s2009_s14   ;;  %s2348_s9 = smov %s1993_s10 }
 0x1c5   : > { %p12_p9 = scmp.ge.s32.totalorder %s15_s14, 4   ;;  %s2349_s10 = smov %s1997_s11 }
 0x1c6   : > { %s2350_s11 = smov %s2079_s21  ;;  %s2351_s12 = smov %s2005_s13 }
 0x1c7   : > { %s2352_s13 = smov %s2354_s16  ;;  %14 = sbr.rel (!%p12_p9) target bundleno = 4 (0x4), region = 78 }
 0x1ce   :  { %1492 = vsyncpa [#allocation3], 1 }
 0x1cf   :  { %1494 = vsyncpa [#allocation3 + $0x1], 1 }

</bundles_post_ra>
